<compile_context>
chip_gen: v7x
topology: tpu7x:2x2x1
jax: 0.10.0
libtpu: 0.0.40
codegen_flags: <defaults>
</compile_context>

<pallas_src>
import functools

import jax
import jax.numpy as jnp
from jax.experimental import pallas as pl
from jax.experimental.pallas import tpu as pltpu


_ACTIVATIONS = {
    "quick_gelu": lambda h: h * jax.nn.sigmoid(1.702 * h),
    "gelu": lambda h: jax.nn.gelu(h, approximate=False),
    "gelu_new": lambda h: jax.nn.gelu(h, approximate=True),
    "relu": jax.nn.relu,
    "sigmoid": jax.nn.sigmoid,
}
# TODO(synk): only the ACT2FN entries above are wired in.

_INTERMEDIATE_BUDGET = 8 << 20   # target bytes for the per-step (block_m, I) h


def _clip_mlp_kernel(x_ref, w1t_ref, b1_ref, w2t_ref, b2_ref, out_ref, *,
                     act_fn, n_chunks, i_chunk):
    """One (block_m, D) row-tile of the fused fc1 -> activation -> fc2."""
    x = x_ref[...]                                    # (block_m, D) compute dtype
    acc = jnp.zeros(out_ref.shape, jnp.float32)       # (block_m, D) f32 accumulator

    # Chunk the (block_m, I) intermediate over I so its VMEM footprint stays
    # bounded (weights remain fully resident; only the activation is chunked).
    for c in range(n_chunks):
        lo = c * i_chunk
        h = jnp.dot(x, w1t_ref[:, lo:lo + i_chunk],
                    preferred_element_type=jnp.float32)
        h = h + b1_ref[:, lo:lo + i_chunk]            # bias add in f32 (VPU)
        h = act_fn(h)                                 # quick_gelu in f32 (EUP)
        h = h.astype(w2t_ref.dtype)                   # back to MXU input dtype
        acc = acc + jnp.dot(h, w2t_ref[lo:lo + i_chunk, :],
                            preferred_element_type=jnp.float32)

    out_ref[...] = (acc + b2_ref[...]).astype(out_ref.dtype)


def _round_up(x, m):
    return ((x + m - 1) // m) * m


def _pick_i_chunk(I, block_m, w_bytes):
    """Largest I-chunk (keeping lane-aligned slices) whose f32+recast h fits."""
    chunk = I
    while (block_m * chunk * (4 + w_bytes) > _INTERMEDIATE_BUDGET
           and chunk % 2 == 0 and (chunk // 2) % 128 == 0):
        chunk //= 2
    return chunk


def _vmem_bytes(block_m, D, I, i_chunk, x_bytes, out_bytes, w_bytes):
    # Conservative: x/out tiles double-buffered, weights counted double-buffered
    # too (in case single-buffering is not honored), plus the h intermediate.
    return (2 * block_m * D * x_bytes            # x tile, 2 buffers
            + 2 * block_m * D * out_bytes        # out tile, 2 buffers
            + 2 * 2 * D * I * w_bytes            # W1.T + W2.T
            + 2 * 4 * (I + D)                    # biases (f32)
            + block_m * i_chunk * 4              # f32 intermediate chunk
            + block_m * i_chunk * w_bytes)       # its recast for fc2


def clip_mlp(hidden_states, params, *, hidden_act="quick_gelu", block_m=None,
             compute_dtype=None, vmem_limit_bytes=None):
    """CLIPMLP forward.

    hidden_states: (..., D) array.
    params: {"fc1": (W1 (I, D), b1 (I,)), "fc2": (W2 (D, I), b2 (D,))} in
            nn.Linear (out_features, in_features) convention.
    """
    orig_shape = hidden_states.shape
    orig_dtype = hidden_states.dtype
    D = orig_shape[-1]
    x2d = jnp.asarray(hidden_states).reshape(-1, D)
    M = x2d.shape[0]

    w1, b1 = params["fc1"]   # (I, D), (I,)
    w2, b2 = params["fc2"]   # (D, I), (D,)
    I = w1.shape[0]
    assert w1.shape == (I, D) and w2.shape == (D, I)

    act_fn = _ACTIVATIONS[hidden_act]

    # bf16 compute by default for f32 inputs (MXU full rate, half weight VMEM);
    # accumulation stays f32 inside the kernel.
    if compute_dtype is None:
        compute_dtype = jnp.bfloat16 if x2d.dtype == jnp.float32 else x2d.dtype

    # Pre-transpose weights ONCE so the kernel computes plain x @ W (no XLU).
    w1t = jnp.asarray(w1).T.astype(compute_dtype)       # (D, I)
    w2t = jnp.asarray(w2).T.astype(compute_dtype)       # (I, D)
    b1r = jnp.asarray(b1).reshape(1, I).astype(jnp.float32)
    b2r = jnp.asarray(b2).reshape(1, D).astype(jnp.float32)
    x2d = x2d.astype(compute_dtype)

    x_bytes = jnp.dtype(compute_dtype).itemsize
    w_bytes = x_bytes
    out_bytes = jnp.dtype(orig_dtype).itemsize

    # Physical VMEM budget (fallback: v7x's 64 MiB per TensorCore).
    try:
        vmem_cap = int(pltpu.get_tpu_info().vmem_capacity_bytes)
    except Exception:
        vmem_cap = 64 << 20
    usable = int(vmem_cap * 0.75)

    # Pick the largest row-tile that fits the VMEM budget.
    m_cap = _round_up(max(M, 1), 8)
    if block_m is None:
        block_m = min(8, m_cap)
        for cand in (512, 256, 128, 64, 32, 16, 8):
            bm = min(cand, m_cap)
            ic = _pick_i_chunk(I, bm, w_bytes)
            if _vmem_bytes(bm, D, I, ic, x_bytes, out_bytes, w_bytes) <= usable:
                block_m = bm
                break
    block_m = min(max(_round_up(block_m, 8), 8), m_cap)
    i_chunk = _pick_i_chunk(I, block_m, w_bytes)
    n_chunks = I // i_chunk

    # Pad the row axis instead of falling back to a single giant block.
    M_pad = _round_up(max(M, 1), block_m)
    if M_pad != M:
        x2d = jnp.pad(x2d, ((0, M_pad - M), (0, 0)))
    grid = (M_pad // block_m,)

    if vmem_limit_bytes is None:
        need = _vmem_bytes(block_m, D, I, i_chunk, x_bytes, out_bytes, w_bytes)
        vmem_limit_bytes = min(max(int(need * 1.4) + (4 << 20), 32 << 20),
                               vmem_cap)

    cost = pl.CostEstimate(
        flops=4 * M_pad * D * I,                 # two (M,D)x(D,I)-class matmuls
        transcendentals=M_pad * I,               # sigmoid in quick_gelu
        bytes_accessed=(M_pad * D * (x_bytes + out_bytes)
                        + 2 * D * I * w_bytes
                        + 4 * (I + D)),
    )

    kernel = functools.partial(_clip_mlp_kernel, act_fn=act_fn,
                               n_chunks=n_chunks, i_chunk=i_chunk)

    def _build(single_buffer_weights):
        if single_buffer_weights:
            def const_spec(shape):
                # Grid-invariant operand: one buffer is enough.
                return pl.BlockSpec(shape, lambda i: (0,) * len(shape),
                                    pipeline_mode=pl.Buffered(1))
        else:
            def const_spec(shape):
                return pl.BlockSpec(shape, lambda i: (0,) * len(shape))
        return pl.pallas_call(
            kernel,
            grid=grid,
            in_specs=[
                pl.BlockSpec((block_m, D), lambda i: (i, 0)),   # x rows (pipelined)
                const_spec((D, I)),                             # W1.T (resident)
                const_spec((1, I)),                             # b1
                const_spec((I, D)),                             # W2.T (resident)
                const_spec((1, D)),                             # b2
            ],
            out_specs=pl.BlockSpec((block_m, D), lambda i: (i, 0)),
            out_shape=jax.ShapeDtypeStruct((M_pad, D), orig_dtype),
            compiler_params=pltpu.CompilerParams(
                dimension_semantics=("parallel",),
                vmem_limit_bytes=int(vmem_limit_bytes)),
            cost_estimate=cost,
        )

    try:
        out = _build(True)(x2d, w1t, b1r, w2t, b2r)
    except Exception:
        # pl.Buffered(1) unsupported in this JAX version/config: fall back to
        # default double-buffering (costs VMEM only; already budgeted for).
        out = _build(False)(x2d, w1t, b1r, w2t, b2r)

    return out[:M].reshape(orig_shape)


def _reference(hidden_states, params):
    """Pure-JAX reproduction of the PyTorch CLIPMLP forward (quick_gelu)."""
    w1, b1 = params["fc1"]
    w2, b2 = params["fc2"]
    h = hidden_states @ w1.T + b1
    h = h * jax.nn.sigmoid(1.702 * h)
    return h @ w2.T + b2


if __name__ == "__main__":
    # --- Small CLIP-like config (tight f32 check) ---------------------------
    B, T, D, I = 2, 8, 32, 128
    k_x, k_w1, k_b1, k_w2, k_b2 = jax.random.split(jax.random.PRNGKey(0), 5)
    x = jax.random.normal(k_x, (B, T, D), dtype=jnp.float32)
    params = {
        "fc1": (0.05 * jax.random.normal(k_w1, (I, D), dtype=jnp.float32),
                0.01 * jax.random.normal(k_b1, (I,), dtype=jnp.float32)),
        "fc2": (0.05 * jax.random.normal(k_w2, (D, I), dtype=jnp.float32),
                0.01 * jax.random.normal(k_b2, (D,), dtype=jnp.float32)),
    }
    out = jax.block_until_ready(clip_mlp(x, params, compute_dtype=jnp.float32))
    ref = _reference(x, params)
    assert out.shape == x.shape and out.dtype == x.dtype
    assert jnp.allclose(out, ref, atol=1e-4, rtol=1e-4)

    # Default (bf16) compute path on the same small problem (loose check).
    out_bf16 = jax.block_until_ready(clip_mlp(x, params))
    assert jnp.allclose(out_bf16, ref, atol=3e-2, rtol=3e-2)

    # --- ViT-B-sized config: exercises M padding (M=2*257=514), lane-dense
    #     D=768 stores, resident bf16 weights, and the I-chunked intermediate.
    B2, T2, D2, I2 = 2, 257, 768, 3072
    k_x2, k_w12, k_b12, k_w22, k_b22 = jax.random.split(jax.random.PRNGKey(1), 5)
    x2 = jax.random.normal(k_x2, (B2, T2, D2), dtype=jnp.float32)
    params2 = {
        "fc1": (0.02 * jax.random.normal(k_w12, (I2, D2), dtype=jnp.float32),
                0.01 * jax.random.normal(k_b12, (I2,), dtype=jnp.float32)),
        "fc2": (0.02 * jax.random.normal(k_w22, (D2, I2), dtype=jnp.float32),
                0.01 * jax.random.normal(k_b22, (D2,), dtype=jnp.float32)),
    }
    out2 = jax.block_until_ready(clip_mlp(x2, params2))
    ref2 = _reference(x2, params2)
    assert out2.shape == x2.shape
    assert jnp.allclose(out2, ref2, atol=5e-2, rtol=5e-2)

    print("KERNEL_OK")
</pallas_src>

<mosaic_0001>
module attributes {stable_mosaic.version = 11 : i64} {
  func.func @_clip_mlp_kernel(%arg0: i32, %arg1: memref<16x32xf32, #tpu.memory_space<vmem>>, %arg2: memref<32x128xf32, #tpu.memory_space<vmem>>, %arg3: memref<1x128xf32, #tpu.memory_space<vmem>>, %arg4: memref<128x32xf32, #tpu.memory_space<vmem>>, %arg5: memref<1x32xf32, #tpu.memory_space<vmem>>, %arg6: memref<16x32xf32, #tpu.memory_space<vmem>>) attributes {dimension_semantics = [#tpu.dimension_semantics<parallel>], iteration_bounds = array<i64: 1>, scalar_prefetch = 0 : i64, scratch_operands = 0 : i64, tpu.core_type = #tpu.core_type<tc>, window_params = [{transform_indices = @transform_0, window_bounds = array<i64: 16, 32>}, {pipeline_mode = #tpu.pipeline_mode<synchronous>, transform_indices = @transform_1, window_bounds = array<i64: 32, 128>}, {pipeline_mode = #tpu.pipeline_mode<synchronous>, transform_indices = @transform_2, window_bounds = array<i64: 1, 128>}, {pipeline_mode = #tpu.pipeline_mode<synchronous>, transform_indices = @transform_3, window_bounds = array<i64: 128, 32>}, {pipeline_mode = #tpu.pipeline_mode<synchronous>, transform_indices = @transform_4, window_bounds = array<i64: 1, 32>}, {transform_indices = @transform_5, window_bounds = array<i64: 16, 32>}]} {
    %c0 = arith.constant 0 : index
    %c0_0 = arith.constant 0 : index
    %0 = vector.load %arg1[%c0, %c0_0] : memref<16x32xf32, #tpu.memory_space<vmem>>, vector<16x32xf32>
    %cst = arith.constant 0.000000e+00 : f32
    %1 = vector.broadcast %cst : f32 to vector<16x32xf32>
    %c0_1 = arith.constant 0 : index
    %c0_2 = arith.constant 0 : index
    %2 = vector.load %arg2[%c0_1, %c0_2] : memref<32x128xf32, #tpu.memory_space<vmem>>, vector<32x128xf32>
    %cst_3 = arith.constant dense<0.000000e+00> : vector<16x128xf32>
    %3 = tpu.matmul %0, %2, %cst_3 {dimension_numbers = #tpu.dot_dimension_numbers<[1], [0], [0], [1], [0, 0, 1, 1], [], []>} : vector<16x32xf32>, vector<32x128xf32>, vector<16x128xf32> -> vector<16x128xf32>
    %c0_4 = arith.constant 0 : index
    %c0_5 = arith.constant 0 : index
    %4 = vector.load %arg3[%c0_4, %c0_5] : memref<1x128xf32, #tpu.memory_space<vmem>>, vector<1x128xf32>
    %5 = vector.broadcast %4 : vector<1x128xf32> to vector<16x128xf32>
    %6 = arith.addf %3, %5 : vector<16x128xf32>
    %cst_6 = arith.constant 1.702000e+00 : f32
    %7 = vector.broadcast %cst_6 : f32 to vector<16x128xf32>
    %8 = arith.mulf %7, %6 : vector<16x128xf32>
    %9 = arith.negf %8 : vector<16x128xf32>
    %10 = math.exp %9 : vector<16x128xf32>
    %cst_7 = arith.constant 1.000000e+00 : f32
    %11 = vector.broadcast %cst_7 : f32 to vector<16x128xf32>
    %12 = arith.addf %11, %10 : vector<16x128xf32>
    %13 = arith.divf %11, %12 : vector<16x128xf32>
    %14 = arith.mulf %6, %13 : vector<16x128xf32>
    %c0_8 = arith.constant 0 : index
    %c0_9 = arith.constant 0 : index
    %15 = vector.load %arg4[%c0_8, %c0_9] : memref<128x32xf32, #tpu.memory_space<vmem>>, vector<128x32xf32>
    %cst_10 = arith.constant dense<0.000000e+00> : vector<16x32xf32>
    %16 = tpu.matmul %14, %15, %cst_10 {dimension_numbers = #tpu.dot_dimension_numbers<[1], [0], [0], [1], [0, 0, 1, 1], [], []>} : vector<16x128xf32>, vector<128x32xf32>, vector<16x32xf32> -> vector<16x32xf32>
    %17 = arith.addf %1, %16 : vector<16x32xf32>
    %c0_11 = arith.constant 0 : index
    %c0_12 = arith.constant 0 : index
    %18 = vector.load %arg5[%c0_11, %c0_12] : memref<1x32xf32, #tpu.memory_space<vmem>>, vector<1x32xf32>
    %19 = vector.broadcast %18 : vector<1x32xf32> to vector<16x32xf32>
    %20 = arith.addf %17, %19 : vector<16x32xf32>
    %c0_13 = arith.constant 0 : index
    %c0_14 = arith.constant 0 : index
    %21 = vector.load %arg6[%c0_13, %c0_14] : memref<16x32xf32, #tpu.memory_space<vmem>>, vector<16x32xf32>
    tpu.vector_store %arg6[%c0_13, %c0_14], %20 {strides = array<i32>} : memref<16x32xf32, #tpu.memory_space<vmem>>, vector<16x32xf32>,
    return
  }
  func.func @transform_0(%arg0: i32) -> (i32, i32) {
    %c0_i32 = arith.constant 0 : i32
    %c0_i32_0 = arith.constant 0 : i32
    return %arg0, %c0_i32 : i32, i32
  }
  func.func @transform_1(%arg0: i32) -> (i32, i32) {
    %c0_i32 = arith.constant 0 : i32
    %c0_i32_0 = arith.constant 0 : i32
    %c0_i32_1 = arith.constant 0 : i32
    return %c0_i32, %c0_i32_0 : i32, i32
  }
  func.func @transform_2(%arg0: i32) -> (i32, i32) {
    %c0_i32 = arith.constant 0 : i32
    %c0_i32_0 = arith.constant 0 : i32
    %c0_i32_1 = arith.constant 0 : i32
    return %c0_i32, %c0_i32_0 : i32, i32
  }
  func.func @transform_3(%arg0: i32) -> (i32, i32) {
    %c0_i32 = arith.constant 0 : i32
    %c0_i32_0 = arith.constant 0 : i32
    %c0_i32_1 = arith.constant 0 : i32
    return %c0_i32, %c0_i32_0 : i32, i32
  }
  func.func @transform_4(%arg0: i32) -> (i32, i32) {
    %c0_i32 = arith.constant 0 : i32
    %c0_i32_0 = arith.constant 0 : i32
    %c0_i32_1 = arith.constant 0 : i32
    return %c0_i32, %c0_i32_0 : i32, i32
  }
  func.func @transform_5(%arg0: i32) -> (i32, i32) {
    %c0_i32 = arith.constant 0 : i32
    %c0_i32_0 = arith.constant 0 : i32
    return %arg0, %c0_i32 : i32, i32
  }
}

module attributes {stable_mosaic.version = 11 : i64} {
  func.func @_clip_mlp_kernel(%arg0: i32, %arg1: memref<16x32xf32, #tpu.memory_space<vmem>>, %arg2: memref<32x128xf32, #tpu.memory_space<vmem>>, %arg3: memref<1x128xf32, #tpu.memory_space<vmem>>, %arg4: memref<128x32xf32, #tpu.memory_space<vmem>>, %arg5: memref<1x32xf32, #tpu.memory_space<vmem>>, %arg6: memref<16x32xf32, #tpu.memory_space<vmem>>) attributes {dimension_semantics = [#tpu.dimension_semantics<parallel>], iteration_bounds = array<i64: 1>, scalar_prefetch = 0 : i64, scratch_operands = 0 : i64, tpu.core_type = #tpu.core_type<tc>, window_params = [{transform_indices = @transform_0, window_bounds = array<i64: 16, 32>}, {pipeline_mode = #tpu.pipeline_mode<synchronous>, transform_indices = @transform_1, window_bounds = array<i64: 32, 128>}, {pipeline_mode = #tpu.pipeline_mode<synchronous>, transform_indices = @transform_2, window_bounds = array<i64: 1, 128>}, {pipeline_mode = #tpu.pipeline_mode<synchronous>, transform_indices = @transform_3, window_bounds = array<i64: 128, 32>}, {pipeline_mode = #tpu.pipeline_mode<synchronous>, transform_indices = @transform_4, window_bounds = array<i64: 1, 32>}, {transform_indices = @transform_5, window_bounds = array<i64: 16, 32>}]} {
    %c0 = arith.constant 0 : index
    %c0_0 = arith.constant 0 : index
    %0 = vector.load %arg1[%c0, %c0_0] : memref<16x32xf32, #tpu.memory_space<vmem>>, vector<16x32xf32>
    %cst = arith.constant 0.000000e+00 : f32
    %1 = vector.broadcast %cst : f32 to vector<16x32xf32>
    %c0_1 = arith.constant 0 : index
    %c0_2 = arith.constant 0 : index
    %2 = vector.load %arg2[%c0_1, %c0_2] : memref<32x128xf32, #tpu.memory_space<vmem>>, vector<32x128xf32>
    %cst_3 = arith.constant dense<0.000000e+00> : vector<16x128xf32>
    %3 = tpu.matmul %0, %2, %cst_3 {dimension_numbers = #tpu.dot_dimension_numbers<[1], [0], [0], [1], [0, 0, 1, 1], [], []>} : vector<16x32xf32>, vector<32x128xf32>, vector<16x128xf32> -> vector<16x128xf32>
    %c0_4 = arith.constant 0 : index
    %c0_5 = arith.constant 0 : index
    %4 = vector.load %arg3[%c0_4, %c0_5] : memref<1x128xf32, #tpu.memory_space<vmem>>, vector<1x128xf32>
    %5 = vector.broadcast %4 : vector<1x128xf32> to vector<16x128xf32>
    %6 = arith.addf %3, %5 : vector<16x128xf32>
    %cst_6 = arith.constant 1.702000e+00 : f32
    %7 = vector.broadcast %cst_6 : f32 to vector<16x128xf32>
    %8 = arith.mulf %7, %6 : vector<16x128xf32>
    %9 = arith.negf %8 : vector<16x128xf32>
    %10 = math.exp %9 : vector<16x128xf32>
    %cst_7 = arith.constant 1.000000e+00 : f32
    %11 = vector.broadcast %cst_7 : f32 to vector<16x128xf32>
    %12 = arith.addf %11, %10 : vector<16x128xf32>
    %13 = arith.divf %11, %12 : vector<16x128xf32>
    %14 = arith.mulf %6, %13 : vector<16x128xf32>
    %c0_8 = arith.constant 0 : index
    %c0_9 = arith.constant 0 : index
    %15 = vector.load %arg4[%c0_8, %c0_9] : memref<128x32xf32, #tpu.memory_space<vmem>>, vector<128x32xf32>
    %cst_10 = arith.constant dense<0.000000e+00> : vector<16x32xf32>
    %16 = tpu.matmul %14, %15, %cst_10 {dimension_numbers = #tpu.dot_dimension_numbers<[1], [0], [0], [1], [0, 0, 1, 1], [], []>} : vector<16x128xf32>, vector<128x32xf32>, vector<16x32xf32> -> vector<16x32xf32>
    %17 = arith.addf %1, %16 : vector<16x32xf32>
    %c0_11 = arith.constant 0 : index
    %c0_12 = arith.constant 0 : index
    %18 = vector.load %arg5[%c0_11, %c0_12] : memref<1x32xf32, #tpu.memory_space<vmem>>, vector<1x32xf32>
    %19 = vector.broadcast %18 : vector<1x32xf32> to vector<16x32xf32>
    %20 = arith.addf %17, %19 : vector<16x32xf32>
    %c0_13 = arith.constant 0 : index
    %c0_14 = arith.constant 0 : index
    %21 = vector.load %arg6[%c0_13, %c0_14] : memref<16x32xf32, #tpu.memory_space<vmem>>, vector<16x32xf32>
    tpu.vector_store %arg6[%c0_13, %c0_14], %20 {strides = array<i32>} : memref<16x32xf32, #tpu.memory_space<vmem>>, vector<16x32xf32>,
    return
  }
  func.func @transform_0(%arg0: i32) -> (i32, i32) {
    %c0_i32 = arith.constant 0 : i32
    %c0_i32_0 = arith.constant 0 : i32
    return %arg0, %c0_i32 : i32, i32
  }
  func.func @transform_1(%arg0: i32) -> (i32, i32) {
    %c0_i32 = arith.constant 0 : i32
    %c0_i32_0 = arith.constant 0 : i32
    %c0_i32_1 = arith.constant 0 : i32
    return %c0_i32, %c0_i32_0 : i32, i32
  }
  func.func @transform_2(%arg0: i32) -> (i32, i32) {
    %c0_i32 = arith.constant 0 : i32
    %c0_i32_0 = arith.constant 0 : i32
    %c0_i32_1 = arith.constant 0 : i32
    return %c0_i32, %c0_i32_0 : i32, i32
  }
  func.func @transform_3(%arg0: i32) -> (i32, i32) {
    %c0_i32 = arith.constant 0 : i32
    %c0_i32_0 = arith.constant 0 : i32
    %c0_i32_1 = arith.constant 0 : i32
    return %c0_i32, %c0_i32_0 : i32, i32
  }
  func.func @transform_4(%arg0: i32) -> (i32, i32) {
    %c0_i32 = arith.constant 0 : i32
    %c0_i32_0 = arith.constant 0 : i32
    %c0_i32_1 = arith.constant 0 : i32
    return %c0_i32, %c0_i32_0 : i32, i32
  }
  func.func @transform_5(%arg0: i32) -> (i32, i32) {
    %c0_i32 = arith.constant 0 : i32
    %c0_i32_0 = arith.constant 0 : i32
    return %arg0, %c0_i32 : i32, i32
  }
}

</mosaic_0001>

<bundles_post_ra>
// kernel: tpu_custom_call.1
= control target key start
LH: loop header
LB: loop body
LE: loop exit
PB: predicated region body
PF: predicated region fallthrough
CT: control target
= control target key end

     0   :  { %vm34_vm0 = vcmask 261120   ;;  %s520_s0 = inlined_call_operand.vmem [shape: f32[16,32], index: 0, kind: input, shape index: {}]   ;;  %s521_s1 = inlined_call_operand.vmem [shape: f32[32,128], index: 1, kind: input, shape index: {}]   ;;  %s522_s2 = inlined_call_operand.vmem [shape: f32[1,128], index: 2, kind: input, shape index: {}]   ;;  %s523_s3 = inlined_call_operand.vmem [shape: f32[128,32], index: 3, kind: input, shape index: {}]   ;;  %s524_s4 = inlined_call_operand.vmem [shape: f32[1,32], index: 4, kind: input, shape index: {}]   ;;  %s525_s5 = inlined_call_operand.hbm [shape: f32[16,32], index: 5, kind: output, shape index: {}]  }
   0x1   :  { %v23_v0 = vld [vmem:[%s521_s1] sm:$0xff]  ;;  %v24_v1 = vld [vmem:[%s521_s1 + $0x8] sm:$0xff]  ;;  %v25_v2 = vld [vmem:[%s521_s1 + $0x10] sm:$0xff] }
   0x2   :  { %v324_v3 = vpack.c.bf16 %v24_v1, %v23_v0  ;;  %v26_v4 = vld [vmem:[%s521_s1 + $0x18] sm:$0xff]  ;;  %v21_v5 = vld [vmem:[%s520_s0] sm:$0xff] }
   0x3   :  { %v328_v6 = vpack.c.bf16 %v26_v4, %v25_v2  ;;  %286 = vmatprep.mubr.msk.f32.mxu0 %vm34_vm0, %v21_v5 }
   0x4   :  { %10 = vsyncpa [#allocation3], 0  ;;  %325 = vmatprep.subr.bf16.mxu0 %v324_v3  ;;  %v22_v7 = vld [vmem:[%s520_s0 + $0x8] sm:$0xff]  ;;  %v132_v8 = vld [vmem:[%s523_s3] sm:$0xff]  ;;  %s399_s11 = smov [#allocation2]  }
   0x5   :  { %327 = vmatpush3.bf16.msra.mxu0 %v324_v3  ;;  %v133_v9 = vld [vmem:[%s523_s3 + $0x8] sm:$0xff]  ;;  %v134_v11 = vld [vmem:[%s523_s3 + $0x10] sm:$0xff]  ;;  %v135_v12 = vld [vmem:[%s523_s3 + $0x18] sm:$0xff]  ;;  %s237_s0 = sshll.u32 %s399_s11, 4  ;;  %s238_s0 = int_to_ptr.vmem [resolvable:$true] %s237_s0 }
   0x6   :  { %329 = vmatprep.subr.bf16.mxu0 %v328_v6  ;;  %v332_v10 = vpack.c.bf16 %v133_v9, %v132_v8  ;;  %v336_v13 = vpack.c.bf16 %v135_v12, %v134_v11  ;;  %v136_v14 = vld [vmem:[%s523_s3 + $0x20] sm:$0xff]  ;;  %v137_v15 = vld [vmem:[%s523_s3 + $0x28] sm:$0xff]  ;;  %v138_v17 = vld [vmem:[%s523_s3 + $0x30] sm:$0xff]  ;;  %s375_s12 = scalar_lea.vmem %s238_s0, 256  ;;  %p380_p1 = scmp.lt.s32.totalorder %s238_s0, %s238_s0 }
   0x7   :  { %v340_v16 = vpack.c.bf16 %v137_v15, %v136_v14  ;;  %v139_v18 = vld [vmem:[%s523_s3 + $0x38] sm:$0xff]  ;;  %v140_v20 = vld [vmem:[%s523_s3 + $0x40] sm:$0xff]  ;;  %v141_v21 = vld [vmem:[%s523_s3 + $0x48] sm:$0xff]  ;;  %p376_p0 = scmp.ne.s32.totalorder %s238_s0, %s375_s12  ;;  %p381_p2 = scmp.lt.s32.totalorder %s375_s12, %s375_s12 }
   0x8   :  { %333 = vmatprep.subr.bf16.mxu1 %v332_v10  ;;  %v344_v19 = vpack.c.bf16 %v139_v18, %v138_v17  ;;  %v348_v22 = vpack.c.bf16 %v141_v21, %v140_v20  ;;  %v142_v23 = vld [vmem:[%s523_s3 + $0x50] sm:$0xff]  ;;  %v143_v24 = vld [vmem:[%s523_s3 + $0x58] sm:$0xff]  ;;  %v144_v26 = vld [vmem:[%s523_s3 + $0x60] sm:$0xff] }
   0x9   :  { %331 = vmatpush3.bf16.msra.mxu0 %v328_v6  ;;  %335 = vmatpush3.bf16.msra.mxu1 %v332_v10  ;;  %v352_v25 = vpack.c.bf16 %v143_v24, %v142_v23  ;;  %v145_v27 = vld [vmem:[%s523_s3 + $0x68] sm:$0xff]  ;;  %v146_v29 = vld [vmem:[%s523_s3 + $0x70] sm:$0xff]  ;;  %v147_v30 = vld [vmem:[%s523_s3 + $0x78] sm:$0xff]  ;;  %p382_p3 = por %p381_p2, %p380_p1 }
   0xa   :  { %337 = vmatprep.subr.bf16.mxu1 %v336_v13  ;;  %v356_v28 = vpack.c.bf16 %v145_v27, %v144_v26  ;;  %v360_v31 = vpack.c.bf16 %v147_v30, %v146_v29  ;;  %v248_v32 = vld [vmem:[%s522_s2] ss:$0 sm:$0xff] }
   0xb   :  { %v253_v49 = vld [vmem:[%s524_s4] ss:$0 sm:$0xff]  ;;  %p383_p4 = pnand %p382_p3, %p376_p0 }
   0xc   :  { %287 = vmatmul.mubr.msk.f32.vlgmr.msra.gmra.mrb[0].mxu0 %vm34_vm0, %v22_v7 }
   0xd   :  { %339 = vmatpush3.bf16.msra.mxu1 %v336_v13 }
   0xe   :  { %341 = vmatprep.subr.bf16.mxu1 %v340_v16 }
  0x11   :  { %343 = vmatpush3.bf16.msra.mxu1 %v340_v16 }
  0x12   :  { %345 = vmatprep.subr.bf16.mxu1 %v344_v19 }
  0x15   :  { %347 = vmatpush3.bf16.msra.mxu1 %v344_v19 }
  0x16   :  { %349 = vmatprep.subr.bf16.mxu1 %v348_v22 }
  0x19   :  { %351 = vmatpush3.bf16.msra.mxu1 %v348_v22 }
  0x1a   :  { %353 = vmatprep.subr.bf16.mxu1 %v352_v25 }
  0x1d   :  { %355 = vmatpush3.bf16.msra.mxu1 %v352_v25 }
  0x1e   :  { %357 = vmatprep.subr.bf16.mxu1 %v356_v28 }
  0x21   :  { %359 = vmatpush3.bf16.msra.mxu1 %v356_v28 }
  0x22   :  { %361 = vmatprep.subr.bf16.mxu1 %v360_v31 }
  0x25   :  { %363 = vmatpush3.bf16.msra.mxu1 %v360_v31 }
  0xdf   :  { %v288_v33 = vpop.f32.mrb[0].mxu0 }
  0xe0   :  { %v113_v34 = vadd.f32 %v288_v33, %v248_v32  ;;  %v107_v35 = vpop.f32.mrb[1].mxu0 }
  0xe1   :  { %v108_v36 = vadd.f32 %v248_v32, %v107_v35 }
  0xe2   :  { %v252_v37 = vmul.f32 -1.702, %v113_v34 }
  0xe3   :  { %v251_v38 = vmul.f32 -1.702, %v108_v36 }
  0xe4   :  { %v122_v39 = vmul.f32 1.442695, %v252_v37 }
  0xe5   :  { %v120_v40 = vmul.f32 1.442695, %v251_v38 }
  0xe6   :  { %367 = vpow2.f32 %v122_v39 }
  0xe7   :  { %369 = vpow2.f32 %v120_v40 }
  0xf0   :  { %v368_v41 = vpop.eup %367 }
  0xf1   :  { %v370_v42 = vpop.eup %369  ;;  %v125_v43 = vadd.f32 1.0, %v368_v41 }
  0xf2   :  { %v124_v44 = vadd.f32 1.0, %v370_v42 }
  0xf3   :  { %371 = vrcp.f32 %v125_v43 }
  0xf4   :  { %373 = vrcp.f32 %v124_v44 }
  0xfd   :  { %v372_v45 = vpop.eup %371 }
  0xfe   :  { %v374_v46 = vpop.eup %373  ;;  %v131_v48 = vmul.f32 %v372_v45, %v113_v34 }
  0xff   :  { %v130_v47 = vmul.f32 %v374_v46, %v108_v36 }
 0x101   :  { %321 = vmatprep.mubr.f32.mxu1 %v130_v47 }
 0x102   :  { %322 = vmatmul.mubr.f32.vlgmr.msra.gmra.mrb[0].mxu1 %v131_v48 }
 0x1d5   :  { %v323_v50 = vpop.f32.mrb[0].mxu1 }
 0x1d6   :  { %v227_v51 = vadd.f32 %v323_v50, %v253_v49  ;;  %v221_v52 = vpop.f32.mrb[1].mxu1 }
 0x1d7   :  { %v222_v53 = vadd.f32 %v253_v49, %v221_v52 }
 0x1d8   :  { %231 = vst.msk [vmem:[#allocation2 + $0x8] sm:$0xff] %vm34_vm0, %v227_v51 }
 0x1d9   :  { %230 = vst.msk [vmem:[#allocation2] sm:$0xff] %vm34_vm0, %v222_v53 }
 0x1da   :  { %386 = shalt.err (!%p383_p4)
}
 0x1db   :  { %s387_s14 = scalar_lea.hbm %s525_s5, 256 }
 0x1dc   :  { %p388_p5 = scmp.ne.s32.totalorder %s525_s5, %s387_s14  ;;  %p391_p6 = scmp.lt.u32.totalorder %s387_s14, %s525_s5 }
 0x1de   :  { %p393_p7 = pnand %p391_p6, %p388_p5 }
 0x1e0   :  { %396 = shalt.err (!%p393_p7)
}
 0x1e1   :  { %s400_s19 = smov 128   ;;  %s401_s20 = smov 8  }
 0x1e2   :  { %243 = dma.vmem_to_hbm [thread:$0]  %s238_s0, 256, %s525_s5, [#allocation3], %s400_s19, %s400_s19, %s401_s20  }
 0x1e3   :  { %397 = dma.done.wait [#allocation3], 256  }
 0x1e4   :  { %398 = vsyncadd [#allocation3], 4294967040 }
 0x1e5   :  { %247 = vsyncpa [#allocation3], 1 }

// kernel: tpu_custom_call.1
= control target key start
LH: loop header
LB: loop body
LE: loop exit
PB: predicated region body
PF: predicated region fallthrough
CT: control target
= control target key end

     0   :  { %vm34_vm0 = vcmask 261120   ;;  %s520_s0 = inlined_call_operand.vmem [shape: f32[16,32], index: 0, kind: input, shape index: {}]   ;;  %s521_s1 = inlined_call_operand.vmem [shape: f32[32,128], index: 1, kind: input, shape index: {}]   ;;  %s522_s2 = inlined_call_operand.vmem [shape: f32[1,128], index: 2, kind: input, shape index: {}]   ;;  %s523_s3 = inlined_call_operand.vmem [shape: f32[128,32], index: 3, kind: input, shape index: {}]   ;;  %s524_s4 = inlined_call_operand.vmem [shape: f32[1,32], index: 4, kind: input, shape index: {}]   ;;  %s525_s5 = inlined_call_operand.hbm [shape: f32[16,32], index: 5, kind: output, shape index: {}]  }
   0x1   :  { %v23_v0 = vld [vmem:[%s521_s1] sm:$0xff]  ;;  %v24_v1 = vld [vmem:[%s521_s1 + $0x8] sm:$0xff]  ;;  %v25_v2 = vld [vmem:[%s521_s1 + $0x10] sm:$0xff] }
   0x2   :  { %v324_v3 = vpack.c.bf16 %v24_v1, %v23_v0  ;;  %v26_v4 = vld [vmem:[%s521_s1 + $0x18] sm:$0xff]  ;;  %v21_v5 = vld [vmem:[%s520_s0] sm:$0xff] }
   0x3   :  { %v328_v6 = vpack.c.bf16 %v26_v4, %v25_v2  ;;  %286 = vmatprep.mubr.msk.f32.mxu0 %vm34_vm0, %v21_v5 }
   0x4   :  { %10 = vsyncpa [#allocation3], 0  ;;  %325 = vmatprep.subr.bf16.mxu0 %v324_v3  ;;  %v22_v7 = vld [vmem:[%s520_s0 + $0x8] sm:$0xff]  ;;  %v132_v8 = vld [vmem:[%s523_s3] sm:$0xff]  ;;  %s399_s11 = smov [#allocation2]  }
   0x5   :  { %327 = vmatpush3.bf16.msra.mxu0 %v324_v3  ;;  %v133_v9 = vld [vmem:[%s523_s3 + $0x8] sm:$0xff]  ;;  %v134_v11 = vld [vmem:[%s523_s3 + $0x10] sm:$0xff]  ;;  %v135_v12 = vld [vmem:[%s523_s3 + $0x18] sm:$0xff]  ;;  %s237_s0 = sshll.u32 %s399_s11, 4  ;;  %s238_s0 = int_to_ptr.vmem [resolvable:$true] %s237_s0 }
   0x6   :  { %329 = vmatprep.subr.bf16.mxu0 %v328_v6  ;;  %v332_v10 = vpack.c.bf16 %v133_v9, %v132_v8  ;;  %v336_v13 = vpack.c.bf16 %v135_v12, %v134_v11  ;;  %v136_v14 = vld [vmem:[%s523_s3 + $0x20] sm:$0xff]  ;;  %v137_v15 = vld [vmem:[%s523_s3 + $0x28] sm:$0xff]  ;;  %v138_v17 = vld [vmem:[%s523_s3 + $0x30] sm:$0xff]  ;;  %s375_s12 = scalar_lea.vmem %s238_s0, 256  ;;  %p380_p1 = scmp.lt.s32.totalorder %s238_s0, %s238_s0 }
   0x7   :  { %v340_v16 = vpack.c.bf16 %v137_v15, %v136_v14  ;;  %v139_v18 = vld [vmem:[%s523_s3 + $0x38] sm:$0xff]  ;;  %v140_v20 = vld [vmem:[%s523_s3 + $0x40] sm:$0xff]  ;;  %v141_v21 = vld [vmem:[%s523_s3 + $0x48] sm:$0xff]  ;;  %p376_p0 = scmp.ne.s32.totalorder %s238_s0, %s375_s12  ;;  %p381_p2 = scmp.lt.s32.totalorder %s375_s12, %s375_s12 }
   0x8   :  { %333 = vmatprep.subr.bf16.mxu1 %v332_v10  ;;  %v344_v19 = vpack.c.bf16 %v139_v18, %v138_v17  ;;  %v348_v22 = vpack.c.bf16 %v141_v21, %v140_v20  ;;  %v142_v23 = vld [vmem:[%s523_s3 + $0x50] sm:$0xff]  ;;  %v143_v24 = vld [vmem:[%s523_s3 + $0x58] sm:$0xff]  ;;  %v144_v26 = vld [vmem:[%s523_s3 + $0x60] sm:$0xff] }
   0x9   :  { %331 = vmatpush3.bf16.msra.mxu0 %v328_v6  ;;  %335 = vmatpush3.bf16.msra.mxu1 %v332_v10  ;;  %v352_v25 = vpack.c.bf16 %v143_v24, %v142_v23  ;;  %v145_v27 = vld [vmem:[%s523_s3 + $0x68] sm:$0xff]  ;;  %v146_v29 = vld [vmem:[%s523_s3 + $0x70] sm:$0xff]  ;;  %v147_v30 = vld [vmem:[%s523_s3 + $0x78] sm:$0xff]  ;;  %p382_p3 = por %p381_p2, %p380_p1 }
   0xa   :  { %337 = vmatprep.subr.bf16.mxu1 %v336_v13  ;;  %v356_v28 = vpack.c.bf16 %v145_v27, %v144_v26  ;;  %v360_v31 = vpack.c.bf16 %v147_v30, %v146_v29  ;;  %v248_v32 = vld [vmem:[%s522_s2] ss:$0 sm:$0xff] }
   0xb   :  { %v253_v49 = vld [vmem:[%s524_s4] ss:$0 sm:$0xff]  ;;  %p383_p4 = pnand %p382_p3, %p376_p0 }
   0xc   :  { %287 = vmatmul.mubr.msk.f32.vlgmr.msra.gmra.mrb[0].mxu0 %vm34_vm0, %v22_v7 }
   0xd   :  { %339 = vmatpush3.bf16.msra.mxu1 %v336_v13 }
   0xe   :  { %341 = vmatprep.subr.bf16.mxu1 %v340_v16 }
  0x11   :  { %343 = vmatpush3.bf16.msra.mxu1 %v340_v16 }
  0x12   :  { %345 = vmatprep.subr.bf16.mxu1 %v344_v19 }
  0x15   :  { %347 = vmatpush3.bf16.msra.mxu1 %v344_v19 }
  0x16   :  { %349 = vmatprep.subr.bf16.mxu1 %v348_v22 }
  0x19   :  { %351 = vmatpush3.bf16.msra.mxu1 %v348_v22 }
  0x1a   :  { %353 = vmatprep.subr.bf16.mxu1 %v352_v25 }
  0x1d   :  { %355 = vmatpush3.bf16.msra.mxu1 %v352_v25 }
  0x1e   :  { %357 = vmatprep.subr.bf16.mxu1 %v356_v28 }
  0x21   :  { %359 = vmatpush3.bf16.msra.mxu1 %v356_v28 }
  0x22   :  { %361 = vmatprep.subr.bf16.mxu1 %v360_v31 }
  0x25   :  { %363 = vmatpush3.bf16.msra.mxu1 %v360_v31 }
  0xdf   :  { %v288_v33 = vpop.f32.mrb[0].mxu0 }
  0xe0   :  { %v113_v34 = vadd.f32 %v288_v33, %v248_v32  ;;  %v107_v35 = vpop.f32.mrb[1].mxu0 }
  0xe1   :  { %v108_v36 = vadd.f32 %v248_v32, %v107_v35 }
  0xe2   :  { %v252_v37 = vmul.f32 -1.702, %v113_v34 }
  0xe3   :  { %v251_v38 = vmul.f32 -1.702, %v108_v36 }
  0xe4   :  { %v122_v39 = vmul.f32 1.442695, %v252_v37 }
  0xe5   :  { %v120_v40 = vmul.f32 1.442695, %v251_v38 }
  0xe6   :  { %367 = vpow2.f32 %v122_v39 }
  0xe7   :  { %369 = vpow2.f32 %v120_v40 }
  0xf0   :  { %v368_v41 = vpop.eup %367 }
  0xf1   :  { %v370_v42 = vpop.eup %369  ;;  %v125_v43 = vadd.f32 1.0, %v368_v41 }
  0xf2   :  { %v124_v44 = vadd.f32 1.0, %v370_v42 }
  0xf3   :  { %371 = vrcp.f32 %v125_v43 }
  0xf4   :  { %373 = vrcp.f32 %v124_v44 }
  0xfd   :  { %v372_v45 = vpop.eup %371 }
  0xfe   :  { %v374_v46 = vpop.eup %373  ;;  %v131_v48 = vmul.f32 %v372_v45, %v113_v34 }
  0xff   :  { %v130_v47 = vmul.f32 %v374_v46, %v108_v36 }
 0x101   :  { %321 = vmatprep.mubr.f32.mxu1 %v130_v47 }
 0x102   :  { %322 = vmatmul.mubr.f32.vlgmr.msra.gmra.mrb[0].mxu1 %v131_v48 }
 0x1d5   :  { %v323_v50 = vpop.f32.mrb[0].mxu1 }
 0x1d6   :  { %v227_v51 = vadd.f32 %v323_v50, %v253_v49  ;;  %v221_v52 = vpop.f32.mrb[1].mxu1 }
 0x1d7   :  { %v222_v53 = vadd.f32 %v253_v49, %v221_v52 }
 0x1d8   :  { %231 = vst.msk [vmem:[#allocation2 + $0x8] sm:$0xff] %vm34_vm0, %v227_v51 }
 0x1d9   :  { %230 = vst.msk [vmem:[#allocation2] sm:$0xff] %vm34_vm0, %v222_v53 }
 0x1da   :  { %386 = shalt.err (!%p383_p4)
}
 0x1db   :  { %s387_s14 = scalar_lea.hbm %s525_s5, 256 }
 0x1dc   :  { %p388_p5 = scmp.ne.s32.totalorder %s525_s5, %s387_s14  ;;  %p391_p6 = scmp.lt.u32.totalorder %s387_s14, %s525_s5 }
 0x1de   :  { %p393_p7 = pnand %p391_p6, %p388_p5 }
 0x1e0   :  { %396 = shalt.err (!%p393_p7)
}
 0x1e1   :  { %s400_s19 = smov 128   ;;  %s401_s20 = smov 8  }
 0x1e2   :  { %243 = dma.vmem_to_hbm [thread:$0]  %s238_s0, 256, %s525_s5, [#allocation3], %s400_s19, %s400_s19, %s401_s20  }
 0x1e3   :  { %397 = dma.done.wait [#allocation3], 256  }
 0x1e4   :  { %398 = vsyncadd [#allocation3], 4294967040 }
 0x1e5   :  { %247 = vsyncpa [#allocation3], 1 }

</bundles_post_ra>
